<compile_context>
chip_gen: v5e
topology: v5e:2x2
jax: 0.10.0
libtpu: 0.0.40
codegen_flags: <defaults>
</compile_context>

<pallas_src>
import jax
import jax.numpy as jnp
from jax import lax
from jax.experimental import pallas as pl
from jax.experimental.pallas import tpu as pltpu

IN_FEATURES = 2048
EPS = 1e-12  # F.normalize default eps


def linear_normalize_kernel(x_ref, w_ref, b_ref, o_ref):
    # bf16 x bf16 -> f32 accumulation on the MXU.
    y = jnp.dot(x_ref[...], w_ref[...], preferred_element_type=jnp.float32)
    y = y + b_ref[...]                                   # (tile_b, F) + (1, F), f32
    # L2 normalize: y / max(||y||, eps) == y * rsqrt(max(sum(y^2), eps^2))
    ss = jnp.sum(y * y, axis=-1, keepdims=True)
    inv = lax.rsqrt(jnp.maximum(ss, EPS * EPS))          # single EUP rsqrt
    o_ref[...] = (y * inv).astype(o_ref.dtype)


def _pick_tile_b(B, multiple=16):
    """Batch tile: multiple of 16 (bf16 sublane packing), <=512 rows, and
    sized so the grid has >=2 steps (pipelining + v7x megacore)."""
    if B <= multiple:
        return multiple
    tile = min(512, pl.cdiv(B, 2))
    return max(multiple, (tile // multiple) * multiple)


def _invariant_spec(block_shape):
    """Grid-invariant block: single-buffer it to save VMEM if this JAX
    version supports pipeline_mode; otherwise use default double-buffering."""
    index_map = lambda i: (0,) * len(block_shape)
    try:
        return pl.BlockSpec(block_shape, index_map, pipeline_mode=pl.Buffered(1))
    except (TypeError, ValueError):
        return pl.BlockSpec(block_shape, index_map)


def linear_forward(x, w_t, b, *, tile_b=None, matmul_dtype=jnp.bfloat16):
    """x: (B, 2048) f32, w_t: (2048, F) f32 (pre-transposed weight), b: (F,) f32."""
    B, K = x.shape
    assert K == IN_FEATURES
    K_, F = w_t.shape
    assert K_ == K and F % 128 == 0, "feature_num should be a multiple of 128"

    if tile_b is None:
        tile_b = _pick_tile_b(B)
    assert tile_b % 16 == 0

    # Cast MXU operands once in the wrapper; bias / accumulation / normalize stay f32.
    x_mm = x.astype(matmul_dtype)
    w_mm = w_t.astype(matmul_dtype)
    b2 = b.reshape(1, F).astype(jnp.float32)

    grid = (pl.cdiv(B, tile_b),)

    itemsize = jnp.dtype(matmul_dtype).itemsize
    vmem_need = (
        2 * tile_b * K * itemsize   # x tile, double-buffered
        + 1 * K * F * itemsize      # weight, single-buffered (grid-invariant)
        + 1 * F * 4                 # bias
        + 2 * tile_b * F * 4        # output tile, double-buffered
    )
    vmem_limit = int(min(max(2 * vmem_need, 16 << 20), 48 << 20))

    grid_spec = pl.GridSpec(
        grid=grid,
        in_specs=[
            pl.BlockSpec((tile_b, K), lambda i: (i, 0)),   # x tile (pipelined)
            _invariant_spec((K, F)),                       # full weight, resident
            _invariant_spec((1, F)),                       # bias, resident
        ],
        out_specs=pl.BlockSpec((tile_b, F), lambda i: (i, 0)),
    )

    return pl.pallas_call(
        linear_normalize_kernel,
        out_shape=jax.ShapeDtypeStruct((B, F), jnp.float32),
        grid_spec=grid_spec,
        compiler_params=pltpu.CompilerParams(
            dimension_semantics=("parallel",),
            vmem_limit_bytes=vmem_limit,
        ),
    )(x_mm, w_mm, b2)


def reference_f32(x, w_t, b):
    y = x @ w_t + b
    n = jnp.sqrt(jnp.sum(y * y, axis=1, keepdims=True))
    return y / jnp.maximum(n, EPS)


def reference_bf16(x, w_t, b):
    # Same bf16-input / f32-accumulation contraction as the kernel.
    y = jnp.dot(x.astype(jnp.bfloat16), w_t.astype(jnp.bfloat16),
                preferred_element_type=jnp.float32) + b
    n = jnp.sqrt(jnp.sum(y * y, axis=1, keepdims=True))
    return y / jnp.maximum(n, EPS)


if __name__ == "__main__":
    feature_num = 128
    batch = 32  # small; tile_b=16 -> 2 grid steps (pipelining + v7x megacore)

    key = jax.random.PRNGKey(0)
    kx, kw, kb = jax.random.split(key, 3)

    # Mimic nn.Linear's uniform(-1/sqrt(in), 1/sqrt(in)) init.
    bound = 1.0 / (IN_FEATURES ** 0.5)
    w = jax.random.uniform(kw, (feature_num, IN_FEATURES), jnp.float32, -bound, bound)
    b = jax.random.uniform(kb, (feature_num,), jnp.float32, -bound, bound)
    w_t = w.T                                   # (2048, feature_num)
    x = jax.random.normal(kx, (batch, IN_FEATURES), jnp.float32)

    out = linear_forward(x, w_t, b)
    out = jax.block_until_ready(out)
    assert out.shape == (batch, feature_num)
    assert bool(jnp.all(jnp.isfinite(out)))

    # Tight check vs. a reference using the same bf16 MXU-input cast.
    ref_b = reference_bf16(x, w_t, b)
    assert jnp.allclose(out, ref_b, atol=2e-3, rtol=2e-3), "mismatch vs bf16 reference"
    # Looser sanity check vs. full-f32 math (bf16 input rounding only).
    ref_f = reference_f32(x, w_t, b)
    assert jnp.allclose(out, ref_f, atol=2e-2, rtol=2e-2), "mismatch vs f32 reference"

    print("KERNEL_OK")
</pallas_src>

<mosaic_0001>
module attributes {stable_mosaic.version = 11 : i64} {
  func.func @linear_normalize_kernel(%arg0: i32, %arg1: memref<16x2048xbf16, #tpu.memory_space<vmem>>, %arg2: memref<2048x128xbf16, #tpu.memory_space<vmem>>, %arg3: memref<1x128xf32, #tpu.memory_space<vmem>>, %arg4: memref<16x128xf32, #tpu.memory_space<vmem>>) attributes {dimension_semantics = [#tpu.dimension_semantics<parallel>], iteration_bounds = array<i64: 2>, scalar_prefetch = 0 : i64, scratch_operands = 0 : i64, tpu.core_type = #tpu.core_type<tc>, window_params = [{transform_indices = @transform_0, window_bounds = array<i64: 16, 2048>}, {pipeline_mode = #tpu.pipeline_mode<synchronous>, transform_indices = @transform_1, window_bounds = array<i64: 2048, 128>}, {pipeline_mode = #tpu.pipeline_mode<synchronous>, transform_indices = @transform_2, window_bounds = array<i64: 1, 128>}, {transform_indices = @transform_3, window_bounds = array<i64: 16, 128>}]} {
    %c0 = arith.constant 0 : index
    %c0_0 = arith.constant 0 : index
    %0 = vector.load %arg1[%c0, %c0_0] : memref<16x2048xbf16, #tpu.memory_space<vmem>>, vector<16x2048xbf16>
    %c0_1 = arith.constant 0 : index
    %c0_2 = arith.constant 0 : index
    %1 = vector.load %arg2[%c0_1, %c0_2] : memref<2048x128xbf16, #tpu.memory_space<vmem>>, vector<2048x128xbf16>
    %cst = arith.constant dense<0.000000e+00> : vector<16x128xf32>
    %2 = tpu.matmul %0, %1, %cst {dimension_numbers = #tpu.dot_dimension_numbers<[1], [0], [0], [1], [0, 0, 1, 1], [], []>} : vector<16x2048xbf16>, vector<2048x128xbf16>, vector<16x128xf32> -> vector<16x128xf32>
    %c0_3 = arith.constant 0 : index
    %c0_4 = arith.constant 0 : index
    %3 = vector.load %arg3[%c0_3, %c0_4] : memref<1x128xf32, #tpu.memory_space<vmem>>, vector<1x128xf32>
    %4 = vector.broadcast %3 : vector<1x128xf32> to vector<16x128xf32>
    %5 = arith.addf %2, %4 : vector<16x128xf32>
    %6 = arith.mulf %5, %5 : vector<16x128xf32>
    %cst_5 = arith.constant dense<0.000000e+00> : vector<16xf32>
    %7 = vector.multi_reduction <add>, %6, %cst_5 [1] : vector<16x128xf32> to vector<16xf32>
    %8 = vector.shape_cast %7 : vector<16xf32> to vector<16x1xf32>
    %cst_6 = arith.constant 1.000000e-24 : f32
    %9 = vector.broadcast %cst_6 : f32 to vector<16x1xf32>
    %10 = arith.maximumf %8, %9 : vector<16x1xf32>
    %11 = math.rsqrt %10 : vector<16x1xf32>
    %12 = vector.broadcast %11 : vector<16x1xf32> to vector<16x128xf32>
    %13 = arith.mulf %5, %12 : vector<16x128xf32>
    %c0_7 = arith.constant 0 : index
    %c0_8 = arith.constant 0 : index
    %14 = vector.load %arg4[%c0_7, %c0_8] : memref<16x128xf32, #tpu.memory_space<vmem>>, vector<16x128xf32>
    tpu.vector_store %arg4[%c0_7, %c0_8], %13 {strides = array<i32>} : memref<16x128xf32, #tpu.memory_space<vmem>>, vector<16x128xf32>,
    return
  }
  func.func @transform_0(%arg0: i32) -> (i32, i32) {
    %c0_i32 = arith.constant 0 : i32
    %c0_i32_0 = arith.constant 0 : i32
    return %arg0, %c0_i32 : i32, i32
  }
  func.func @transform_1(%arg0: i32) -> (i32, i32) {
    %c0_i32 = arith.constant 0 : i32
    %c0_i32_0 = arith.constant 0 : i32
    %c0_i32_1 = arith.constant 0 : i32
    return %c0_i32, %c0_i32_0 : i32, i32
  }
  func.func @transform_2(%arg0: i32) -> (i32, i32) {
    %c0_i32 = arith.constant 0 : i32
    %c0_i32_0 = arith.constant 0 : i32
    %c0_i32_1 = arith.constant 0 : i32
    return %c0_i32, %c0_i32_0 : i32, i32
  }
  func.func @transform_3(%arg0: i32) -> (i32, i32) {
    %c0_i32 = arith.constant 0 : i32
    %c0_i32_0 = arith.constant 0 : i32
    return %arg0, %c0_i32 : i32, i32
  }
}

</mosaic_0001>

<bundles_post_ra>
// kernel: tpu_custom_call.1
= control target key start
LH: loop header
LB: loop body
LE: loop exit
PB: predicated region body
PF: predicated region fallthrough
CT: control target
= control target key end

     0   :  { %8 = vsyncpa [#allocation3], 0  ;;  %s2836_s0 = inlined_call_operand.hbm [shape: bf16[32,2048], index: 0, kind: input, shape index: {}]   ;;  %s2837_s1 = inlined_call_operand.hbm [shape: bf16[2048,128], index: 1, kind: input, shape index: {}]   ;;  %s2838_s2 = inlined_call_operand.vmem [shape: f32[1,128], index: 2, kind: input, shape index: {}]   ;;  %s2839_s3 = inlined_call_operand.hbm [shape: f32[32,128], index: 3, kind: output, shape index: {}]  }
   0x1   :  { %10 = vsyncpa [#allocation3 + $0x1], 0 }
   0x2   :  { %11 = vsyncpa [#allocation6], 0 }
   0x3   :  { %12 = vsyncpa [#allocation4], 0 }
   0x4   :  { %14 = vsyncpa [#allocation4 + $0x1], 0  ;;  %s2655_s12 = smov 0   ;;  %s2657_s13 = smov 0  }
   0x5   :  { %s2659_s14 = smov 0   ;;  %s2661_s15 = smov 0  }
   0x6 LB: > { %s2676_s16 = sadd.s32 4294967295, %s2627_s15   ;;  %s1690_s17 = sadd.s32 4294967294, %s2627_s15   ;;  %s2627_s15 = sphi %s2661_s15, %s2849_s15   ;;  %s2623_s14 = sphi %s2659_s14, %s2848_s14   ;;  %s2619_s13 = sphi %s2657_s13, %s2847_s13   ;;  %s2615_s12 = sphi %s2655_s12, %s2846_s12  }
   0x7   : > { %p40_p0 = scmp.ne.s32.totalorder %s2619_s13, %s2615_s12  ;;  %p41_p1 = scmp.eq.s32.totalorder %s2676_s16, 0 }
   0x8   : > { %p106_p2 = scmp.eq.s32.totalorder %s2676_s16, 1  ;;  %p112_p3 = scmp.eq.s32.totalorder %s1690_s17, 1 }
   0x9   : > { %p2685_p4 = por %p41_p1, %p40_p0  ;;  %p1691_p5 = scmp.ge.s32.totalorder %s2627_s15, 1 }
   0xa   : > { %p2690_p6 = por %p112_p3, %p40_p0  ;;  %p119_p7 = scmp.lt.s32.totalorder %s2627_s15, 3 }
   0xb   : > { %s130_s22 = sshll.u32 %s2837_s1, 4  ;;  %s2629_s24 = smov [#allocation5]   ;;  %s131_s22 = int_to_ptr.hbm [resolvable:$true] %s130_s22 }
   0xc   : > { %p2698_p8 = pnand %p1691_p5, %p119_p7  ;;  %s132_s25 = sshll.u32 %s2629_s24, 4  ;;  %s133_s25 = int_to_ptr.vmem [resolvable:$true] %s132_s25 }
   0xd   : > { %s2708_s26 = sadd.s32 1, %s2627_s15   ;;  %s2630_s27 = smov 64  }
   0xe   : > { %p2438_p9 = pneg %p2698_p8  ;;  %s2631_s28 = smov 4  }
   0xf   : > { %s24_s29 = ssub.s32 %s2627_s15, %s2708_s26  ;;  %s27_s30 = sadd.s32 1, %s2623_s14 }
  0x10   : > { %p2439_p10 = pnand %p2438_p9, %p41_p1  ;;  %p25_p12 = scmp.eq.s32.totalorder %s24_s29, 0 }
  0x11   : > { %p34_p13 = scmp.ne.s32.totalorder %s2623_s14, %s2619_s13  ;;  %p35_p0 = scmp.eq.s32.totalorder %s2627_s15, 0 }
  0x12   : > { %2441 = dma.hbm_to_vmem [thread:$0]  (!%p2439_p10), %s131_s22, 16384, %s133_s25, [#allocation6], %s2630_s27, %s2630_s27, %s2631_s28  }
  0x13   : > { %p2451_p3 = scmp.lt.s32.totalorder %s2627_s15, 2  ;;  %p36_p5 = por %p35_p0, %p34_p13 }
  0x14   : > { %s2720_s4 = scalar_select %p25_p12, %s2623_s14, %s27_s30  }
  0x15   : > { %p2724_p7 = por %p106_p2, %p34_p13  ;;  %s149_s6 = sand.u32 1, %s2623_s14  }
  0x16   : > { %s2284_s7 = sshll.u32 %s2627_s15, 7  ;;  %s1694_s8 = sshll.u32 %s149_s6, 7 }
  0x17   : > { %s159_s11 = scalar_lea.hbm %s2836_s0, %s2284_s7  ;;  %s153_s20 = scalar_lea.vmem [#allocation2], %s1694_s8 }
  0x18   : > { %s160_s17 = sshll.u32 %s159_s11, 4  ;;  %s162_s21 = sshll.u32 %s153_s20, 4  ;;  %s161_s17 = int_to_ptr.hbm [resolvable:$true] %s160_s17  ;;  %s163_s21 = int_to_ptr.vmem [resolvable:$true] %s162_s21 }
  0x19   : > { %p2735_p9 = pnand %p2451_p3, %p36_p5  ;;  %s150_s24 = scalar_lea.sflag [#allocation3], %s149_s6 }
  0x1a   : > { %s2527_s25 = sshra.s32 %s161_s17, 4  ;;  %s2534_s7 = scalar_lea.hbm %s2836_s0, 256  ;;  %s2528_s25 = int_to_ptr.hbm [resolvable:$true] %s2527_s25 }
  0x1b   : > { %s2529_s28 = scalar_lea.hbm %s2528_s25, 128  ;;  %p2531_p10 = pneg %p2735_p9 }
  0x1c   : > { %p2530_p2 = scmp.ne.s32.totalorder %s2528_s25, %s2529_s28  ;;  %p2535_p0 = scmp.lt.s32.totalorder %s2528_s25, %s2836_s0 }
  0x1d   : > { %p2536_p3 = scmp.lt.s32.totalorder %s2534_s7, %s2529_s28 }
  0x1e   : > { %p2532_p12 = pnand %p2531_p10, %p2530_p2 }
  0x1f   : > { %p2537_p5 = por %p2536_p3, %p2535_p0 }
  0x20   : > { %p2533_p13 = pneg %p2532_p12 }
  0x22   : > { %p2538_p11 = pnand %p2537_p5, %p2533_p13 }
  0x24   : > { %2541 = shalt.err (!%p2538_p11)
}
  0x25   : > { %s2632_s6 = smov 1024   ;;  %174 = sbr.rel (%p2698_p8) target bundleno = 463 (0x1cf), region = 32 }
  0x26   : > { %2445 = dma.hbm_to_vmem [thread:$0]  (!%p2735_p9), %s161_s17, 2048, %s163_s21, %s150_s24, %s2632_s6, %s2632_s6, %s2630_s27  }
  0x27   : > { %s2753_s10 = sand.u32 (!%p2698_p8), 1, %s2619_s13  }
  0x28   : > { %s1699_s11 = sshll.u32 (!%p2698_p8), %s2753_s10, 7  ;;  %s177_s20 = scalar_lea.sflag (!%p2698_p8), [#allocation3], %s2753_s10 }
  0x29   : > { %s2757_s25 = scalar_lea.vmem (!%p2698_p8), [#allocation2], %s1699_s11 }
  0x2a   : > { %2602 = dma.done.wait (%p2685_p4), %s177_s20, 2048  }
  0x2b   : > { %2604 = vsyncadd (%p2685_p4), %s177_s20, 4294965248 }
  0x2c   : > { %2606 = dma.done.wait (%p41_p1), [#allocation6], 16384  }
  0x2d   : > { %2608 = vsyncadd (%p41_p1), [#allocation6], 4294950912  ;;  %v2308_v0 = vld [vmem:[#allocation5 + $0x38] sm:$0xff]  ;;  %v2307_v4 = vld [vmem:[#allocation5 + $0x30] sm:$0xff]  ;;  %s1701_s27 = sshll.u32 %s2753_s10, 4  ;;  %s2429_s17 = sshll.u32 %s2676_s16, 4 }
  0x2e   : > { %v2316_v1 = vld [vmem:[#allocation5 + $0x78] sm:$0xff]  ;;  %1335 = vmatpush.bf16.msra.mxu0 %v2308_v0  ;;  %v2315_v5 = vld [vmem:[#allocation5 + $0x70] sm:$0xff]  ;;  %v2306_v8 = vld [vmem:[#allocation5 + $0x28] sm:$0xff]  ;;  %s1603_s24 = scalar_lea.hbm %s2839_s3, %s2429_s17  ;;  %s208_s28 = scalar_lea.vmem [#allocation7], %s1701_s27 }
  0x2f   : > { %v2324_v2 = vld [vmem:[#allocation5 + $0xb8] sm:$0xff]  ;;  %1349 = vmatpush.bf16.msra.mxu1 %v2316_v1  ;;  %v2323_v6 = vld [vmem:[#allocation5 + $0xb0] sm:$0xff]  ;;  %v2314_v9 = vld [vmem:[#allocation5 + $0x68] sm:$0xff]  ;;  %s1604_s29 = sshll.u32 %s208_s28, 4  ;;  %s1606_s30 = sshll.u32 %s1603_s24, 4  ;;  %s1605_s29 = int_to_ptr.vmem [resolvable:$true] %s1604_s29  ;;  %s1607_s30 = int_to_ptr.hbm [resolvable:$true] %s1606_s30 }
  0x30   : > { %v2332_v3 = vld [vmem:[#allocation5 + $0xf8] sm:$0xff]  ;;  %1363 = vmatpush.bf16.msra.mxu2 %v2324_v2  ;;  %v2331_v7 = vld [vmem:[#allocation5 + $0xf0] sm:$0xff]  ;;  %v2322_v10 = vld [vmem:[#allocation5 + $0xa8] sm:$0xff]  ;;  %s1592_s16 = scalar_lea.sflag [#allocation4], %s2753_s10  ;;  %s2571_s7 = sshra.s32 %s1607_s30, 4  ;;  %s2572_s7 = int_to_ptr.hbm [resolvable:$true] %s2571_s7 }
  0x31   : > { %1377 = vmatpush.bf16.msra.mxu3 %v2332_v3  ;;  %v2330_v11 = vld [vmem:[#allocation5 + $0xe8] sm:$0xff]  ;;  %v2305_v12 = vld [vmem:[#allocation5 + $0x20] sm:$0xff]  ;;  %v2304_v16 = vld [vmem:[#allocation5 + $0x18] sm:$0xff]  ;;  %s2573_s8 = scalar_lea.hbm %s2572_s7, 16  ;;  %s2577_s11 = scalar_lea.hbm %s2839_s3, 32 }
  0x32   : > { %1336 = vmatpush.bf16.msra.mxu0 %v2307_v4  ;;  %v2313_v13 = vld [vmem:[#allocation5 + $0x60] sm:$0xff]  ;;  %v2312_v17 = vld [vmem:[#allocation5 + $0x58] sm:$0xff]  ;;  %v2303_v20 = vld [vmem:[#allocation5 + $0x10] sm:$0xff]  ;;  %p2574_p1 = scmp.ne.s32.totalorder %s2572_s7, %s2573_s8  ;;  %p2578_p11 = scmp.lt.s32.totalorder %s2572_s7, %s2839_s3 }
  0x33   : > { %1350 = vmatpush.bf16.msra.mxu1 %v2315_v5  ;;  %v2321_v14 = vld [vmem:[#allocation5 + $0xa0] sm:$0xff]  ;;  %v2320_v18 = vld [vmem:[#allocation5 + $0x98] sm:$0xff]  ;;  %v2311_v21 = vld [vmem:[#allocation5 + $0x50] sm:$0xff]  ;;  %p2579_p9 = scmp.lt.s32.totalorder %s2577_s11, %s2573_s8 }
  0x34   : > { %1364 = vmatpush.bf16.msra.mxu2 %v2323_v6  ;;  %v2329_v15 = vld [vmem:[#allocation5 + $0xe0] sm:$0xff]  ;;  %v2328_v19 = vld [vmem:[#allocation5 + $0xd8] sm:$0xff]  ;;  %v2319_v22 = vld [vmem:[#allocation5 + $0x90] sm:$0xff]  ;;  %p2575_p4 = pnand %p2574_p1, %p2724_p7 }
  0x35   : > { %1378 = vmatpush.bf16.msra.mxu3 %v2331_v7  ;;  %v2327_v23 = vld [vmem:[#allocation5 + $0xd0] sm:$0xff]  ;;  %v2302_v24 = vld [vmem:[#allocation5 + $0x8] sm:$0xff]  ;;  %v2301_v28 = vld [vmem:[#allocation5] sm:$0xff]  ;;  %p2580_p2 = por %p2579_p9, %p2578_p11 }
  0x36   : > { %1337 = vmatpush.bf16.msra.mxu0 %v2306_v8  ;;  %v2310_v25 = vld [vmem:[#allocation5 + $0x48] sm:$0xff]  ;;  %v2309_v29 = vld [vmem:[#allocation5 + $0x40] sm:$0xff]  ;;  %v2340_v32 = vld [vmem:[#allocation5 + $0x138] sm:$0xff]  ;;  %p2576_p8 = pneg %p2575_p4 }
  0x37   : > { %1351 = vmatpush.bf16.msra.mxu1 %v2314_v9  ;;  %v2318_v26 = vld [vmem:[#allocation5 + $0x88] sm:$0xff]  ;;  %v2317_v30 = vld [vmem:[#allocation5 + $0x80] sm:$0xff]  ;;  %v2348_v33 = vld [vmem:[#allocation5 + $0x178] sm:$0xff] }
  0x38   : > { %1365 = vmatpush.bf16.msra.mxu2 %v2322_v10  ;;  %v2326_v27 = vld [vmem:[#allocation5 + $0xc8] sm:$0xff]  ;;  %v2325_v31 = vld [vmem:[#allocation5 + $0xc0] sm:$0xff]  ;;  %v2356_v42 = vld [vmem:[#allocation5 + $0x1b8] sm:$0xff]  ;;  %p2581_p10 = pnand %p2580_p2, %p2576_p8 }
  0x39   : > { %1379 = vmatpush.bf16.msra.mxu3 %v2330_v11  ;;  %v1704_v34 = vld [vmem:[%s2757_s25] sm:$0xf]  ;;  %v1712_v36 = vld [vmem:[%s2757_s25 + $0x8] sm:$0xf]  ;;  %v2285_v38 = vld [vmem:[%s2757_s25 + $0x4] sm:$0xf] }
  0x3a   : > { %1338 = vmatpush.bf16.msra.mxu0 %v2305_v12  ;;  %v2293_v35 = vld [vmem:[%s2757_s25 + $0x3c] sm:$0xf0]  ;;  %v2294_v37 = vld [vmem:[%s2757_s25 + $0x44] sm:$0xf0]  ;;  %v1706_v39 = vld [vmem:[%s2757_s25 + $0x40] sm:$0xf0] }
  0x3b   : > { %1352 = vmatpush.bf16.msra.mxu1 %v2313_v13  ;;  %v2286_v40 = vld [vmem:[%s2757_s25 + $0xc] sm:$0xf]  ;;  %v2364_v43 = vld [vmem:[#allocation5 + $0x1f8] sm:$0xff]  ;;  %v1705_v44 = vor.u32 %v2293_v35, %v1704_v34  ;;  %v1713_v45 = vor.u32 %v2294_v37, %v1712_v36  ;;  %v1709_v46 = vor.u32 %v2285_v38, %v1706_v39  ;;  %v2339_v48 = vld [vmem:[#allocation5 + $0x130] sm:$0xff] }
  0x3c   : > { %1366 = vmatpush.bf16.msra.mxu2 %v2321_v14  ;;  %v1714_v41 = vld [vmem:[%s2757_s25 + $0x48] sm:$0xf0]  ;;  %v2347_v49 = vld [vmem:[#allocation5 + $0x170] sm:$0xff]  ;;  %v2337_v56 = vld [vmem:[#allocation5 + $0x120] sm:$0xff] }
  0x3d   : > { %1380 = vmatpush.bf16.msra.mxu3 %v2329_v15  ;;  %v1717_v47 = vor.u32 %v2286_v40, %v1714_v41  ;;  %v2355_v50 = vld [vmem:[#allocation5 + $0x1b0] sm:$0xff]  ;;  %v2338_v52 = vld [vmem:[#allocation5 + $0x128] sm:$0xff]  ;;  %v2345_v57 = vld [vmem:[#allocation5 + $0x160] sm:$0xff] }
  0x3e   : > { %1339 = vmatpush.bf16.msra.mxu0 %v2304_v16  ;;  %v2363_v51 = vld [vmem:[#allocation5 + $0x1f0] sm:$0xff]  ;;  %v2346_v53 = vld [vmem:[#allocation5 + $0x168] sm:$0xff]  ;;  %v2353_v58 = vld [vmem:[#allocation5 + $0x1a0] sm:$0xff] }
  0x3f   : > { %1353 = vmatpush.bf16.msra.mxu1 %v2312_v17  ;;  %v2354_v54 = vld [vmem:[#allocation5 + $0x1a8] sm:$0xff]  ;;  %v2361_v59 = vld [vmem:[#allocation5 + $0x1e0] sm:$0xff]  ;;  %v2336_v60 = vld [vmem:[#allocation5 + $0x118] sm:$0xff] }
  0x40   : > { %1367 = vmatpush.bf16.msra.mxu2 %v2320_v18  ;;  %v2362_v55 = vld [vmem:[#allocation5 + $0x1e8] sm:$0xff]  ;;  %v2344_v61 = vld [vmem:[#allocation5 + $0x158] sm:$0xff]  ;;  %v2335_v0 = vld [vmem:[#allocation5 + $0x110] sm:$0xff] }
  0x41   : > { %1381 = vmatpush.bf16.msra.mxu3 %v2328_v19  ;;  %v2352_v62 = vld [vmem:[#allocation5 + $0x198] sm:$0xff]  ;;  %v2343_v1 = vld [vmem:[#allocation5 + $0x150] sm:$0xff]  ;;  %v2334_v4 = vld [vmem:[#allocation5 + $0x108] sm:$0xff] }
  0x42   : > { %1340 = vmatpush.bf16.msra.mxu0 %v2303_v20  ;;  %v2360_v63 = vld [vmem:[#allocation5 + $0x1d8] sm:$0xff]  ;;  %v2351_v2 = vld [vmem:[#allocation5 + $0x190] sm:$0xff]  ;;  %v2342_v5 = vld [vmem:[#allocation5 + $0x148] sm:$0xff] }
  0x43   : > { %1354 = vmatpush.bf16.msra.mxu1 %v2311_v21  ;;  %v2359_v3 = vld [vmem:[#allocation5 + $0x1d0] sm:$0xff]  ;;  %v2350_v6 = vld [vmem:[#allocation5 + $0x188] sm:$0xff]  ;;  %v2333_v8 = vld [vmem:[#allocation5 + $0x100] sm:$0xff] }
  0x44   : > { %1368 = vmatpush.bf16.msra.mxu2 %v2319_v22  ;;  %v2358_v7 = vld [vmem:[#allocation5 + $0x1c8] sm:$0xff]  ;;  %v2341_v9 = vld [vmem:[#allocation5 + $0x140] sm:$0xff]  ;;  %v2372_v12 = vld [vmem:[#allocation5 + $0x238] sm:$0xff] }
  0x45   : > { %1382 = vmatpush.bf16.msra.mxu3 %v2327_v23  ;;  %v2349_v10 = vld [vmem:[#allocation5 + $0x180] sm:$0xff]  ;;  %v2380_v13 = vld [vmem:[#allocation5 + $0x278] sm:$0xff]  ;;  %v1720_v14 = vld [vmem:[%s2757_s25 + $0x10] sm:$0xf] }
  0x46   : > { %1341 = vmatpush.bf16.msra.mxu0 %v2302_v24  ;;  %v2357_v11 = vld [vmem:[#allocation5 + $0x1c0] sm:$0xff]  ;;  %v2295_v15 = vld [vmem:[%s2757_s25 + $0x4c] sm:$0xf0]  ;;  %v1728_v16 = vld [vmem:[%s2757_s25 + $0x18] sm:$0xf] }
  0x47   : > { %1355 = vmatpush.bf16.msra.mxu1 %v2310_v25  ;;  %v2296_v17 = vld [vmem:[%s2757_s25 + $0x54] sm:$0xf0]  ;;  %v2287_v18 = vld [vmem:[%s2757_s25 + $0x14] sm:$0xf]  ;;  %v2288_v20 = vld [vmem:[%s2757_s25 + $0x1c] sm:$0xf]  ;;  %v1721_v24 = vor.u32 %v2295_v15, %v1720_v14 }
  0x48   : > { %1369 = vmatpush.bf16.msra.mxu2 %v2318_v26  ;;  %v1722_v19 = vld [vmem:[%s2757_s25 + $0x50] sm:$0xf0]  ;;  %v1730_v21 = vld [vmem:[%s2757_s25 + $0x58] sm:$0xf0]  ;;  %v1729_v25 = vor.u32 %v2296_v17, %v1728_v16  ;;  %v2386_v34 = vld [vmem:[#allocation5 + $0x2a8] sm:$0xff] }
  0x49   : > { %1383 = vmatpush.bf16.msra.mxu3 %v2326_v27  ;;  %v2388_v22 = vld [vmem:[#allocation5 + $0x2b8] sm:$0xff]  ;;  %v1725_v26 = vor.u32 %v2287_v18, %v1722_v19  ;;  %v1733_v27 = vor.u32 %v2288_v20, %v1730_v21  ;;  %v2394_v35 = vld [vmem:[#allocation5 + $0x2e8] sm:$0xff]  ;;  %v2369_v36 = vld [vmem:[#allocation5 + $0x220] sm:$0xff] }
  0x4a   : > { %1342 = vmatpush.bf16.msra.mxu0 %v2301_v28  ;;  %v2396_v23 = vld [vmem:[#allocation5 + $0x2f8] sm:$0xff]  ;;  %v2371_v28 = vld [vmem:[#allocation5 + $0x230] sm:$0xff]  ;;  %v2377_v37 = vld [vmem:[#allocation5 + $0x260] sm:$0xff] }
  0x4b   : > { %1356 = vmatpush.bf16.msra.mxu1 %v2309_v29  ;;  %v2379_v29 = vld [vmem:[#allocation5 + $0x270] sm:$0xff]  ;;  %v2385_v38 = vld [vmem:[#allocation5 + $0x2a0] sm:$0xff]  ;;  %v2368_v40 = vld [vmem:[#allocation5 + $0x218] sm:$0xff] }
  0x4c   : > { %1370 = vmatpush.bf16.msra.mxu2 %v2317_v30  ;;  %v2387_v30 = vld [vmem:[#allocation5 + $0x2b0] sm:$0xff]  ;;  %v2393_v39 = vld [vmem:[#allocation5 + $0x2e0] sm:$0xff]  ;;  %v2376_v41 = vld [vmem:[#allocation5 + $0x258] sm:$0xff] }
  0x4d   : > { %1384 = vmatpush.bf16.msra.mxu3 %v2325_v31  ;;  %1343 = vmatmul.bf16.vlgmr.msra.gmra.mxu0 %v1705_v44  ;;  %v2395_v31 = vld [vmem:[#allocation5 + $0x2f0] sm:$0xff]  ;;  %v2418_v14 = vld [vmem:[#allocation5 + $0x3a8] sm:$0xff]  ;;  %v2401_v16 = vld [vmem:[#allocation5 + $0x320] sm:$0xff] }
  0x4e   : > { %1391 = vmatpush.bf16.msrb.mxu0 %v2340_v32  ;;  %1357 = vmatmul.bf16.vlgmr.msra.gmra.mxu1 %v1709_v46  ;;  %v2370_v32 = vld [vmem:[#allocation5 + $0x228] sm:$0xff]  ;;  %v2367_v44 = vld [vmem:[#allocation5 + $0x210] sm:$0xff]  ;;  %v2409_v17 = vld [vmem:[#allocation5 + $0x360] sm:$0xff] }
  0x4f   : > { %1405 = vmatpush.bf16.msrb.mxu1 %v2348_v33  ;;  %1371 = vmatmul.bf16.vlgmr.msra.gmra.mxu2 %v1713_v45  ;;  %v2378_v33 = vld [vmem:[#allocation5 + $0x268] sm:$0xff]  ;;  %v2375_v45 = vld [vmem:[#allocation5 + $0x250] sm:$0xff]  ;;  %v2417_v18 = vld [vmem:[#allocation5 + $0x3a0] sm:$0xff] }
  0x50   : > { %1419 = vmatpush.bf16.msrb.mxu2 %v2356_v42  ;;  %1385 = vmatmul.bf16.vlgmr.msra.gmra.mxu3 %v1717_v47  ;;  %v2384_v42 = vld [vmem:[#allocation5 + $0x298] sm:$0xff]  ;;  %v2383_v46 = vld [vmem:[#allocation5 + $0x290] sm:$0xff]  ;;  %v2426_v15 = vld [vmem:[#allocation5 + $0x3e8] sm:$0xff] }
  0x51   : > { %1433 = vmatpush.bf16.msrb.mxu3 %v2364_v43  ;;  %v2392_v43 = vld [vmem:[#allocation5 + $0x2d8] sm:$0xff]  ;;  %v2391_v47 = vld [vmem:[#allocation5 + $0x2d0] sm:$0xff]  ;;  %v2425_v19 = vld [vmem:[#allocation5 + $0x3e0] sm:$0xff] }
  0x52   : > { %1392 = vmatpush.bf16.msrb.mxu0 %v2339_v48  ;;  %v2366_v48 = vld [vmem:[#allocation5 + $0x208] sm:$0xff]  ;;  %v2400_v20 = vld [vmem:[#allocation5 + $0x318] sm:$0xff] }
  0x53   : > { %1406 = vmatpush.bf16.msrb.mxu1 %v2347_v49  ;;  %v2374_v49 = vld [vmem:[#allocation5 + $0x248] sm:$0xff]  ;;  %v2408_v21 = vld [vmem:[#allocation5 + $0x358] sm:$0xff] }
  0x54   : > { %1420 = vmatpush.bf16.msrb.mxu2 %v2355_v50  ;;  %v2382_v50 = vld [vmem:[#allocation5 + $0x288] sm:$0xff] }
  0x55   : > { %1434 = vmatpush.bf16.msrb.mxu3 %v2363_v51  ;;  %v2390_v51 = vld [vmem:[#allocation5 + $0x2c8] sm:$0xff] }
  0x56   : > { %1393 = vmatpush.bf16.msrb.mxu0 %v2338_v52  ;;  %v2365_v52 = vld [vmem:[#allocation5 + $0x200] sm:$0xff] }
  0x57   : > { %1407 = vmatpush.bf16.msrb.mxu1 %v2346_v53  ;;  %v2373_v53 = vld [vmem:[#allocation5 + $0x240] sm:$0xff] }
  0x58   : > { %1421 = vmatpush.bf16.msrb.mxu2 %v2354_v54  ;;  %v2381_v54 = vld [vmem:[#allocation5 + $0x280] sm:$0xff] }
  0x59   : > { %1435 = vmatpush.bf16.msrb.mxu3 %v2362_v55  ;;  %v2389_v55 = vld [vmem:[#allocation5 + $0x2c0] sm:$0xff] }
  0x5a   : > { %1394 = vmatpush.bf16.msrb.mxu0 %v2337_v56  ;;  %v2404_v56 = vld [vmem:[#allocation5 + $0x338] sm:$0xff] }
  0x5b   : > { %1408 = vmatpush.bf16.msrb.mxu1 %v2345_v57  ;;  %v2412_v57 = vld [vmem:[#allocation5 + $0x378] sm:$0xff] }
  0x5c   : > { %1422 = vmatpush.bf16.msrb.mxu2 %v2353_v58  ;;  %v1736_v58 = vld [vmem:[%s2757_s25 + $0x20] sm:$0xf] }
  0x5d   : > { %1436 = vmatpush.bf16.msrb.mxu3 %v2361_v59  ;;  %v2297_v59 = vld [vmem:[%s2757_s25 + $0x5c] sm:$0xf0] }
  0x5e   : > { %1395 = vmatpush.bf16.msrb.mxu0 %v2336_v60  ;;  %v1744_v60 = vld [vmem:[%s2757_s25 + $0x28] sm:$0xf] }
  0x5f   : > { %1409 = vmatpush.bf16.msrb.mxu1 %v2344_v61  ;;  %v2298_v61 = vld [vmem:[%s2757_s25 + $0x64] sm:$0xf0] }
  0x60   : > { %1423 = vmatpush.bf16.msrb.mxu2 %v2352_v62  ;;  %v2289_v62 = vld [vmem:[%s2757_s25 + $0x24] sm:$0xf] }
  0x61   : > { %1437 = vmatpush.bf16.msrb.mxu3 %v2360_v63  ;;  %v1738_v63 = vld [vmem:[%s2757_s25 + $0x60] sm:$0xf0] }
  0x62   : > { %1396 = vmatpush.bf16.msrb.mxu0 %v2335_v0  ;;  %v2290_v0 = vld [vmem:[%s2757_s25 + $0x2c] sm:$0xf] }
  0x63   : > { %1410 = vmatpush.bf16.msrb.mxu1 %v2343_v1  ;;  %v1746_v1 = vld [vmem:[%s2757_s25 + $0x68] sm:$0xf0] }
  0x64   : > { %1424 = vmatpush.bf16.msrb.mxu2 %v2351_v2  ;;  %v2420_v2 = vld [vmem:[#allocation5 + $0x3b8] sm:$0xff] }
  0x65   : > { %1438 = vmatpush.bf16.msrb.mxu3 %v2359_v3  ;;  %v2428_v3 = vld [vmem:[#allocation5 + $0x3f8] sm:$0xff] }
  0x66   : > { %1397 = vmatpush.bf16.msrb.mxu0 %v2334_v4  ;;  %v1737_v4 = vor.u32 %v2297_v59, %v1736_v58 }
  0x67   : > { %1411 = vmatpush.bf16.msrb.mxu1 %v2342_v5  ;;  %v1745_v5 = vor.u32 %v2298_v61, %v1744_v60 }
  0x68   : > { %1425 = vmatpush.bf16.msrb.mxu2 %v2350_v6  ;;  %v1741_v6 = vor.u32 %v2289_v62, %v1738_v63 }
  0x69   : > { %1439 = vmatpush.bf16.msrb.mxu3 %v2358_v7  ;;  %v1749_v7 = vor.u32 %v2290_v0, %v1746_v1 }
  0x6a   : > { %1398 = vmatpush.bf16.msrb.mxu0 %v2333_v8  ;;  %v2403_v8 = vld [vmem:[#allocation5 + $0x330] sm:$0xff] }
  0x6b   : > { %1412 = vmatpush.bf16.msrb.mxu1 %v2341_v9  ;;  %v2411_v9 = vld [vmem:[#allocation5 + $0x370] sm:$0xff] }
  0x6c   : > { %1426 = vmatpush.bf16.msrb.mxu2 %v2349_v10  ;;  %v2419_v10 = vld [vmem:[#allocation5 + $0x3b0] sm:$0xff] }
  0x6d   : > { %1440 = vmatpush.bf16.msrb.mxu3 %v2357_v11  ;;  %1399 = vmatmul.bf16.vlgmr.msrb.gmra.mxu0 %v1721_v24  ;;  %v2427_v11 = vld [vmem:[#allocation5 + $0x3f0] sm:$0xff] }
  0x6e   : > { %1447 = vmatpush.bf16.msra.mxu0 %v2372_v12  ;;  %1413 = vmatmul.bf16.vlgmr.msrb.gmra.mxu1 %v1725_v26  ;;  %v2402_v12 = vld [vmem:[#allocation5 + $0x328] sm:$0xff]  ;;  %v2399_v24 = vld [vmem:[#allocation5 + $0x310] sm:$0xff] }
  0x6f   : > { %1461 = vmatpush.bf16.msra.mxu1 %v2380_v13  ;;  %1427 = vmatmul.bf16.vlgmr.msrb.gmra.mxu2 %v1729_v25  ;;  %v2410_v13 = vld [vmem:[#allocation5 + $0x368] sm:$0xff]  ;;  %v2407_v25 = vld [vmem:[#allocation5 + $0x350] sm:$0xff] }
  0x70   : > { %1475 = vmatpush.bf16.msra.mxu2 %v2388_v22  ;;  %1441 = vmatmul.bf16.vlgmr.msrb.gmra.mxu3 %v1733_v27  ;;  %v2416_v22 = vld [vmem:[#allocation5 + $0x398] sm:$0xff]  ;;  %v2415_v26 = vld [vmem:[#allocation5 + $0x390] sm:$0xff] }
  0x71   : > { %1489 = vmatpush.bf16.msra.mxu3 %v2396_v23  ;;  %v2424_v23 = vld [vmem:[#allocation5 + $0x3d8] sm:$0xff]  ;;  %v2423_v27 = vld [vmem:[#allocation5 + $0x3d0] sm:$0xff] }
  0x72   : > { %1448 = vmatpush.bf16.msra.mxu0 %v2371_v28  ;;  %v2398_v28 = vld [vmem:[#allocation5 + $0x308] sm:$0xff] }
  0x73   : > { %1462 = vmatpush.bf16.msra.mxu1 %v2379_v29  ;;  %v2406_v29 = vld [vmem:[#allocation5 + $0x348] sm:$0xff] }
  0x74   : > { %1476 = vmatpush.bf16.msra.mxu2 %v2387_v30  ;;  %v2414_v30 = vld [vmem:[#allocation5 + $0x388] sm:$0xff] }
  0x75   : > { %1490 = vmatpush.bf16.msra.mxu3 %v2395_v31  ;;  %v2422_v31 = vld [vmem:[#allocation5 + $0x3c8] sm:$0xff] }
  0x76   : > { %1449 = vmatpush.bf16.msra.mxu0 %v2370_v32  ;;  %v2397_v32 = vld [vmem:[#allocation5 + $0x300] sm:$0xff] }
  0x77   : > { %1463 = vmatpush.bf16.msra.mxu1 %v2378_v33  ;;  %v2405_v33 = vld [vmem:[#allocation5 + $0x340] sm:$0xff] }
  0x78   : > { %1477 = vmatpush.bf16.msra.mxu2 %v2386_v34  ;;  %v2413_v34 = vld [vmem:[#allocation5 + $0x380] sm:$0xff] }
  0x79   : > { %1491 = vmatpush.bf16.msra.mxu3 %v2394_v35  ;;  %v2421_v35 = vld [vmem:[#allocation5 + $0x3c0] sm:$0xff] }
  0x7a   : > { %1450 = vmatpush.bf16.msra.mxu0 %v2369_v36  ;;  %v1752_v36 = vld [vmem:[%s2757_s25 + $0x30] sm:$0xf] }
  0x7b   : > { %1464 = vmatpush.bf16.msra.mxu1 %v2377_v37  ;;  %v2299_v37 = vld [vmem:[%s2757_s25 + $0x6c] sm:$0xf0] }
  0x7c   : > { %1478 = vmatpush.bf16.msra.mxu2 %v2385_v38  ;;  %v2291_v38 = vld [vmem:[%s2757_s25 + $0x34] sm:$0xf] }
  0x7d   : > { %1492 = vmatpush.bf16.msra.mxu3 %v2393_v39  ;;  %v1754_v39 = vld [vmem:[%s2757_s25 + $0x70] sm:$0xf0] }
  0x7e   : > { %1451 = vmatpush.bf16.msra.mxu0 %v2368_v40  ;;  %v1760_v40 = vld [vmem:[%s2757_s25 + $0x38] sm:$0xf] }
  0x7f   : > { %1465 = vmatpush.bf16.msra.mxu1 %v2376_v41  ;;  %v2300_v41 = vld [vmem:[%s2757_s25 + $0x74] sm:$0xf0] }
  0x80   : > { %1479 = vmatpush.bf16.msra.mxu2 %v2384_v42  ;;  %v2292_v42 = vld [vmem:[%s2757_s25 + $0x3c] sm:$0xf] }
  0x81   : > { %1493 = vmatpush.bf16.msra.mxu3 %v2392_v43  ;;  %v1762_v43 = vld [vmem:[%s2757_s25 + $0x78] sm:$0xf0] }
  0x82   : > { %1452 = vmatpush.bf16.msra.mxu0 %v2367_v44  ;;  %v1753_v44 = vor.u32 %v2299_v37, %v1752_v36 }
  0x83   : > { %1466 = vmatpush.bf16.msra.mxu1 %v2375_v45  ;;  %v1757_v45 = vor.u32 %v2291_v38, %v1754_v39 }
  0x84   : > { %1480 = vmatpush.bf16.msra.mxu2 %v2383_v46  ;;  %v1761_v46 = vor.u32 %v2300_v41, %v1760_v40 }
  0x85   : > { %1494 = vmatpush.bf16.msra.mxu3 %v2391_v47  ;;  %v1765_v47 = vor.u32 %v2292_v42, %v1762_v43 }
  0x86   : > { %1453 = vmatpush.bf16.msra.mxu0 %v2366_v48 }
  0x87   : > { %1467 = vmatpush.bf16.msra.mxu1 %v2374_v49 }
  0x88   : > { %1481 = vmatpush.bf16.msra.mxu2 %v2382_v50 }
  0x89   : > { %1495 = vmatpush.bf16.msra.mxu3 %v2390_v51 }
  0x8a   : > { %1454 = vmatpush.bf16.msra.mxu0 %v2365_v52 }
  0x8b   : > { %1468 = vmatpush.bf16.msra.mxu1 %v2373_v53  ;;  %v2492_v53 = vld [vmem:[%s2838_s2] ss:$0 sm:$0xff] }
  0x8c   : > { %1482 = vmatpush.bf16.msra.mxu2 %v2381_v54 }
  0x8d   : > { %1496 = vmatpush.bf16.msra.mxu3 %v2389_v55  ;;  %1455 = vmatmul.bf16.vlgmr.msra.gmra.mxu0 %v1737_v4 }
  0x8e   : > { %1503 = vmatpush.bf16.msrb.mxu0 %v2404_v56  ;;  %1469 = vmatmul.bf16.vlgmr.msra.gmra.mxu1 %v1741_v6 }
  0x8f   : > { %1517 = vmatpush.bf16.msrb.mxu1 %v2412_v57  ;;  %1483 = vmatmul.bf16.vlgmr.msra.gmra.mxu2 %v1745_v5 }
  0x90   : > { %1531 = vmatpush.bf16.msrb.mxu2 %v2420_v2  ;;  %1497 = vmatmul.bf16.vlgmr.msra.gmra.mxu3 %v1749_v7 }
  0x91   : > { %1545 = vmatpush.bf16.msrb.mxu3 %v2428_v3 }
  0x92   : > { %1504 = vmatpush.bf16.msrb.mxu0 %v2403_v8 }
  0x93   : > { %1518 = vmatpush.bf16.msrb.mxu1 %v2411_v9 }
  0x94   : > { %1532 = vmatpush.bf16.msrb.mxu2 %v2419_v10 }
  0x95   : > { %1546 = vmatpush.bf16.msrb.mxu3 %v2427_v11 }
  0x96   : > { %1505 = vmatpush.bf16.msrb.mxu0 %v2402_v12 }
  0x97   : > { %1519 = vmatpush.bf16.msrb.mxu1 %v2410_v13 }
  0x98   : > { %1533 = vmatpush.bf16.msrb.mxu2 %v2418_v14 }
  0x99   : > { %1547 = vmatpush.bf16.msrb.mxu3 %v2426_v15 }
  0x9a   : > { %1506 = vmatpush.bf16.msrb.mxu0 %v2401_v16 }
  0x9b   : > { %1520 = vmatpush.bf16.msrb.mxu1 %v2409_v17 }
  0x9c   : > { %1534 = vmatpush.bf16.msrb.mxu2 %v2417_v18 }
  0x9d   : > { %1548 = vmatpush.bf16.msrb.mxu3 %v2425_v19 }
  0x9e   : > { %1507 = vmatpush.bf16.msrb.mxu0 %v2400_v20 }
  0x9f   : > { %1521 = vmatpush.bf16.msrb.mxu1 %v2408_v21 }
  0xa0   : > { %1535 = vmatpush.bf16.msrb.mxu2 %v2416_v22 }
  0xa1   : > { %1549 = vmatpush.bf16.msrb.mxu3 %v2424_v23 }
  0xa2   : > { %1508 = vmatpush.bf16.msrb.mxu0 %v2399_v24 }
  0xa3   : > { %1522 = vmatpush.bf16.msrb.mxu1 %v2407_v25 }
  0xa4   : > { %1536 = vmatpush.bf16.msrb.mxu2 %v2415_v26 }
  0xa5   : > { %1550 = vmatpush.bf16.msrb.mxu3 %v2423_v27 }
  0xa6   : > { %1509 = vmatpush.bf16.msrb.mxu0 %v2398_v28 }
  0xa7   : > { %1523 = vmatpush.bf16.msrb.mxu1 %v2406_v29 }
  0xa8   : > { %1537 = vmatpush.bf16.msrb.mxu2 %v2414_v30 }
  0xa9   : > { %1551 = vmatpush.bf16.msrb.mxu3 %v2422_v31 }
  0xaa   : > { %1510 = vmatpush.bf16.msrb.mxu0 %v2397_v32 }
  0xab   : > { %1524 = vmatpush.bf16.msrb.mxu1 %v2405_v33 }
  0xac   : > { %1538 = vmatpush.bf16.msrb.mxu2 %v2413_v34 }
  0xad   : > { %1552 = vmatpush.bf16.msrb.mxu3 %v2421_v35  ;;  %1511 = vmatmul.bf16.vlgmr.msrb.gmra.mxu0 %v1753_v44 }
  0xae   : > { %1525 = vmatmul.bf16.vlgmr.msrb.gmra.mxu1 %v1757_v45 }
  0xaf   : > { %1539 = vmatmul.bf16.vlgmr.msrb.gmra.mxu2 %v1761_v46 }
  0xb0   : > { %1553 = vmatmul.bf16.vlgmr.msrb.gmra.mxu3 %v1765_v47 }
  0xca   : > { %v1344_v48 = vpop.f32.mrf.mxu0 }
  0xcb   : > { %v1358_v49 = vpop.f32.mrf.mxu1  ;;  %v1345_v55 = vadd.f32 %v2492_v53, %v1344_v48 }
  0xcd   : > { %v1359_v58 = vadd.f32 %v1358_v49, %v1345_v55 }
  0xd2   : > { %v1372_v50 = vpop.f32.mrf.mxu2  ;;  %v1346_v52 = vpop.f32.mrf.mxu0 }
  0xd3   : > { %v1386_v51 = vpop.f32.mrf.mxu3  ;;  %v1360_v54 = vpop.f32.mrf.mxu1  ;;  %v1373_v61 = vadd.f32 %v1372_v50, %v1359_v58  ;;  %v1347_v62 = vadd.f32 %v2492_v53, %v1346_v52 }
  0xd5   : > { %v1387_v1 = vadd.f32 %v1386_v51, %v1373_v61  ;;  %v1361_v2 = vadd.f32 %v1360_v54, %v1347_v62 }
  0xda   : > { %v1374_v56 = vpop.f32.mrf.mxu2 }
  0xdb   : > { %v1388_v57 = vpop.f32.mrf.mxu3  ;;  %v1375_v6 = vadd.f32 %v1374_v56, %v1361_v2 }
  0xdd   : > { %v1389_v10 = vadd.f32 %v1388_v57, %v1375_v6 }
  0xea   : > { %v1400_v59 = vpop.f32.mrf.mxu0 }
  0xeb   : > { %v1414_v60 = vpop.f32.mrf.mxu1  ;;  %v1401_v4 = vadd.f32 %v1400_v59, %v1387_v1 }
  0xed   : > { %v1415_v7 = vadd.f32 %v1414_v60, %v1401_v4 }
  0xf2   : > { %v1428_v63 = vpop.f32.mrf.mxu2  ;;  %v1402_v3 = vpop.f32.mrf.mxu0 }
  0xf3   : > { %v1442_v0 = vpop.f32.mrf.mxu3  ;;  %v1416_v5 = vpop.f32.mrf.mxu1  ;;  %v1429_v12 = vadd.f32 %v1428_v63, %v1415_v7  ;;  %v1403_v14 = vadd.f32 %v1402_v3, %v1389_v10 }
  0xf5   : > { %v1443_v15 = vadd.f32 %v1442_v0, %v1429_v12  ;;  %v1417_v18 = vadd.f32 %v1416_v5, %v1403_v14 }
  0xfa   : > { %v1430_v8 = vpop.f32.mrf.mxu2 }
  0xfb   : > { %v1444_v9 = vpop.f32.mrf.mxu3  ;;  %v1431_v20 = vadd.f32 %v1430_v8, %v1417_v18 }
  0xfd   : > { %v1445_v24 = vadd.f32 %v1444_v9, %v1431_v20 }
 0x10a   : > { %v1456_v11 = vpop.f32.mrf.mxu0 }
 0x10b   : > { %v1470_v13 = vpop.f32.mrf.mxu1  ;;  %v1457_v19 = vadd.f32 %v1456_v11, %v1443_v15 }
 0x10d   : > { %v1471_v22 = vadd.f32 %v1470_v13, %v1457_v19 }
 0x112   : > { %v1484_v16 = vpop.f32.mrf.mxu2  ;;  %v1458_v21 = vpop.f32.mrf.mxu0 }
 0x113   : > { %v1498_v17 = vpop.f32.mrf.mxu3  ;;  %v1472_v23 = vpop.f32.mrf.mxu1  ;;  %v1485_v25 = vadd.f32 %v1484_v16, %v1471_v22  ;;  %v1459_v26 = vadd.f32 %v1458_v21, %v1445_v24 }
 0x115   : > { %v1499_v29 = vadd.f32 %v1498_v17, %v1485_v25  ;;  %v1473_v31 = vadd.f32 %v1472_v23, %v1459_v26 }
 0x11a   : > { %v1486_v27 = vpop.f32.mrf.mxu2 }
 0x11b   : > { %v1500_v28 = vpop.f32.mrf.mxu3  ;;  %v1487_v34 = vadd.f32 %v1486_v27, %v1473_v31 }
 0x11d   : > { %v1501_v38 = vadd.f32 %v1500_v28, %v1487_v34 }
 0x12a   : > { %v1512_v30 = vpop.f32.mrf.mxu0 }
 0x12b   : > { %v1513_v32 = vadd.f32 %v1512_v30, %v1499_v29  ;;  %v1526_v33 = vpop.f32.mrf.mxu1 }
 0x12d   : > { %v1527_v35 = vadd.f32 %v1526_v33, %v1513_v32 }
 0x132   : > { %v1540_v36 = vpop.f32.mrf.mxu2  ;;  %v1514_v40 = vpop.f32.mrf.mxu0 }
 0x133   : > { %v1554_v37 = vpop.f32.mrf.mxu3  ;;  %v1541_v39 = vadd.f32 %v1540_v36, %v1527_v35  ;;  %v1515_v42 = vadd.f32 %v1514_v40, %v1501_v38  ;;  %v1528_v44 = vpop.f32.mrf.mxu1 }
 0x135   : > { %v1555_v41 = vadd.f32 %v1554_v37, %v1541_v39  ;;  %v1529_v45 = vadd.f32 %v1528_v44, %v1515_v42 }
 0x137   : > { %v1559_v43 = vmul.f32 %v1555_v41, %v1555_v41 }
 0x139   : > { %1561 = vadd.xlane.f32.xlu0 %v1559_v43 }
 0x13a   : > { %v1542_v46 = vpop.f32.mrf.mxu2 }
 0x13b   : > { %v1543_v47 = vadd.f32 %v1542_v46, %v1529_v45  ;;  %v1556_v48 = vpop.f32.mrf.mxu3 }
 0x13d   : > { %v1557_v49 = vadd.f32 %v1556_v48, %v1543_v47 }
 0x13f   : > { %v1560_v50 = vmul.f32 %v1557_v49, %v1557_v49 }
 0x141   : > { %1563 = vadd.xlane.f32.xlu0 %v1560_v50 }
 0x1ac   : > { %v1562_v51 = vpop.xlane.xlu0 %1561 }
 0x1ad   : > { %v1565_v52 = vmax.f32 %v1562_v51, 1e-24 }
 0x1af   : > { %2493 = vrsqrt.f32 %v1565_v52  ;;  %vm1573_vm1 = vweird.f32 %v1565_v52 }
 0x1b4   : > { %v1564_v53 = vpop.xlane.xlu0 %1563 }
 0x1b5   : > { %v2494_v54 = vpop.eup %2493  ;;  %v1566_v55 = vmax.f32 %v1564_v53, 1e-24 }
 0x1b6   : > { %v1568_v56 = vmul.f32 %v2494_v54, %v1565_v52  ;;  %vm1574_vm0 = vweird.f32 %v2494_v54 }
 0x1b7   : > { %2495 = vrsqrt.f32 %v1566_v55  ;;  %vm1575_vm2 = vmor %vm1573_vm1, %vm1574_vm0  ;;  %vm1583_vm4 = vweird.f32 %v1566_v55 }
 0x1b8   : > { %v1569_v57 = vmul.f32 %v2494_v54, %v1568_v56 }
 0x1ba   : > { %v1570_v58 = vmul.f32 0.5, %v1569_v57 }
 0x1bc   : > { %v1571_v59 = vsub.f32 1.5, %v1570_v58 }
 0x1bd   : > { %v2496_v60 = vpop.eup %2495 }
 0x1be   : > { %v1572_v61 = vmul.f32 %v2494_v54, %v1571_v59  ;;  %v1578_v62 = vmul.f32 %v2496_v60, %v1566_v55  ;;  %vm1584_vm3 = vweird.f32 %v2496_v60 }
 0x1bf   : > { %vm1585_vm5 = vmor %vm1583_vm4, %vm1584_vm3 }
 0x1c0   : > { %v1576_v63 = vsel %vm1575_vm2, %v2494_v54, %v1572_v61  ;;  %v1579_v0 = vmul.f32 %v2496_v60, %v1578_v62 }
 0x1c1   : > { %v1587_v1 = vmul.f32 %v1576_v63, %v1555_v41 }
 0x1c2   : > { %v1580_v2 = vmul.f32 0.5, %v1579_v0 }
 0x1c3   : > { %1589 = vst [vmem:[%s208_s28] sm:$0xff] %v1587_v1 }
 0x1c4   : > { %v1581_v3 = vsub.f32 1.5, %v1580_v2 }
 0x1c6   : > { %v1582_v4 = vmul.f32 %v2496_v60, %v1581_v3 }
 0x1c8   : > { %v1586_v5 = vsel %vm1585_vm5, %v2496_v60, %v1582_v4 }
 0x1c9   : > { %v1588_v6 = vmul.f32 %v1586_v5, %v1557_v49 }
 0x1cb   : > { %1590 = vst [vmem:[%s208_s28 + $0x8] sm:$0xff] %v1588_v6 }
 0x1cc   : > { %2584 = shalt.err (!%p2581_p10)
}
 0x1cd   : > { %s2633_s10 = smov 128   ;;  %s2634_s18 = smov 8  }
 0x1ce   : > { %2436 = dma.vmem_to_hbm [thread:$0]  (%p2724_p7), %s1605_s29, 256, %s1607_s30, %s1592_s16, %s2633_s10, %s2633_s10, %s2634_s18  }
 0x1cf PF: > { %s1621_s23 = sand.u32 1, %s2615_s12   ;;  %p2845_p12 = scmp.ge.s32.totalorder %s2627_s15, 2 }
 0x1d0   : > { %s1622_s27 = scalar_lea.sflag [#allocation4], %s1621_s23 }
 0x1d1   : > { %p2447_p13 = pnand %p2845_p12, %p2690_p6 }
 0x1d3   : > { %p2448_p0 = pneg %p2447_p13 }
 0x1d5   : > { %2610 = dma.done.wait (%p2448_p0), %s1622_s27, 256  }
 0x1d6   : > { %2612 = vsyncadd (%p2448_p0), %s1622_s27, 4294967040  ;;  %p17_p3 = scmp.ge.s32.totalorder %s2708_s26, 4   ;;  %s2846_s12 = smov %s2619_s13 }
 0x1d7   : > { %s2847_s13 = smov %s2623_s14  ;;  %s2848_s14 = smov %s2720_s4 }
 0x1d8   : > { %s2849_s15 = smov %s2708_s26  ;;  %19 = sbr.rel (!%p17_p3) target bundleno = 6 (0x6), region = 81 }
 0x1dd   :  { %1628 = vsyncpa [#allocation3], 1 }
 0x1de   :  { %1630 = vsyncpa [#allocation3 + $0x1], 1 }
 0x1df   :  { %1631 = vsyncpa [#allocation6], 1 }
 0x1e0   :  { %1632 = vsyncpa [#allocation4], 1 }
 0x1e1   :  { %1634 = vsyncpa [#allocation4 + $0x1], 1 }

</bundles_post_ra>
